<compile_context>
chip_gen: v5e
topology: v5e:2x2
jax: 0.10.0
libtpu: 0.0.40
codegen_flags: <defaults>
</compile_context>

<pallas_src>
import functools
import math

import jax
import jax.numpy as jnp
from jax.experimental import pallas as pl
from jax.experimental.pallas import tpu as pltpu


# ----------------------------------------------------------------------------- kernel --
def _controller_seq_kernel(num_layers, hidden, *refs):
    """One grid step == one LSTM timestep over all layers.

    refs = (x_seq, h0, c0, [w_ih_t, w_hh_t, bias] * L, y, h_state, c_state)
      x_seq block : (1, B, in)           -- this timestep's input
      h0/c0       : (L, B, H) f32        -- initial state (read only at t == 0)
      w_ih_t      : (in_dim_l, 4H)       -- pre-transposed, possibly bf16, VMEM-resident
      w_hh_t      : (H, 4H)              -- pre-transposed, possibly bf16, VMEM-resident
      bias        : (B, 4H) f32          -- b_ih + b_hh, pre-broadcast over batch
      y block     : (1, B, H) f32        -- per-step output (last layer's h)
      h/c_state   : (L, B, H) f32        -- constant index_map => VMEM-resident running
                                            state; written back to HBM once at the end
                                            (aliased onto the donated h0/c0 buffers).
    """
    x_ref, h0_ref, c0_ref = refs[:3]
    layer_refs = refs[3:3 + 3 * num_layers]
    y_ref, h_ref, c_ref = refs[3 + 3 * num_layers:]

    t = pl.program_id(0)
    H = hidden

    @pl.when(t == 0)
    def _init():
        h_ref[...] = h0_ref[...]
        c_ref[...] = c0_ref[...]

    # Hoist the recurrent matmuls: they depend only on the *previous timestep's* state,
    # not on the previous layer of this timestep, so all their MXU pushes can overlap
    # the serial x-dependent chain below.
    hh = []
    for l in range(num_layers):
        w_hh_t = layer_refs[3 * l + 1][...]
        hh.append(jnp.dot(h_ref[l].astype(w_hh_t.dtype), w_hh_t,
                          preferred_element_type=jnp.float32))

    x = x_ref[0]  # (B, in), f32
    for l in range(num_layers):           # small static L -> unrolled
        w_ih_t = layer_refs[3 * l][...]    # (in_dim_l, 4H)
        bias = layer_refs[3 * l + 2][...]  # (B, 4H) f32, pre-broadcast

        gates = (jnp.dot(x.astype(w_ih_t.dtype), w_ih_t,
                         preferred_element_type=jnp.float32)
                 + hh[l] + bias)           # (B, 4H) f32

        # One full-(8,128)-vreg EUP pass each instead of four quarter-vreg passes.
        sg = jax.nn.sigmoid(gates)
        tg = jnp.tanh(gates)
        i = sg[:, 0 * H:1 * H]
        f = sg[:, 1 * H:2 * H]
        g = tg[:, 2 * H:3 * H]
        o = sg[:, 3 * H:4 * H]

        c = f * c_ref[l] + i * g           # f32 state math (v5e-safe)
        h = o * jnp.tanh(c)

        h_ref[l] = h
        c_ref[l] = c
        x = h                              # input to the next layer

    y_ref[0] = x                           # outputs.squeeze(0) for this timestep


# --------------------------------------------------------------------------- wrappers --
def controller_forward_seq(x_seq, h0, c0, params):
    """Run T fused controller steps.

    x_seq : (T, B, input_size) f32
    h0/c0 : (L, B, H) f32          (donated: aliased onto the returned state)
    params: list of (w_ih_t, w_hh_t, bias) per layer, as built by `prepare_params`.
    Returns (y_seq (T, B, H), (h_new, c_new)).
    """
    T, B, _ = x_seq.shape
    L, _, H = h0.shape

    flat = []
    for (w_ih_t, w_hh_t, b) in params:
        flat += [w_ih_t, w_hh_t, b]

    const3 = lambda t: (0, 0, 0)
    const2 = lambda t: (0, 0)

    in_specs = [
        pl.BlockSpec((1, B, x_seq.shape[-1]), lambda t: (t, 0, 0)),  # per-step input
        pl.BlockSpec((L, B, H), const3),                             # h0 (fetched once)
        pl.BlockSpec((L, B, H), const3),                             # c0 (fetched once)
    ]
    for (w_ih_t, w_hh_t, b) in params:  # constant index_map => weights stay in VMEM
        in_specs += [
            pl.BlockSpec(w_ih_t.shape, const2),
            pl.BlockSpec(w_hh_t.shape, const2),
            pl.BlockSpec(b.shape, const2),
        ]

    out_specs = (
        pl.BlockSpec((1, B, H), lambda t: (t, 0, 0)),   # per-step output
        pl.BlockSpec((L, B, H), const3),                # running h state (resident)
        pl.BlockSpec((L, B, H), const3),                # running c state (resident)
    )

    kernel = functools.partial(_controller_seq_kernel, L, H)
    y, h_new, c_new = pl.pallas_call(
        kernel,
        grid=(T,),
        out_shape=(
            jax.ShapeDtypeStruct((T, B, H), jnp.float32),
            jax.ShapeDtypeStruct((L, B, H), jnp.float32),
            jax.ShapeDtypeStruct((L, B, H), jnp.float32),
        ),
        in_specs=in_specs,
        out_specs=out_specs,
        input_output_aliases={1: 1, 2: 2},  # donate h0 -> h_new, c0 -> c_new
        compiler_params=pltpu.CompilerParams(
            dimension_semantics=("arbitrary",)),        # sequential state carry over time
    )(x_seq, h0, c0, *flat)
    return y, (h_new, c_new)


def controller_forward(x, h0, c0, params):
    """Single `forward` call of the module: x (B, input_size) -> (B, H), new state."""
    y, state = controller_forward_seq(x[None], h0, c0, params)
    return y[0], state


# -------------------------------------------------------------------- params & reference --
def init_controller_params(key, input_size, output_size, num_layers):
    """Synthetic init matching the PyTorch __init__ distributions (f32 raw params)."""
    stdev = 5.0 / math.sqrt(input_size + output_size)
    H = output_size
    raw = []
    keys = jax.random.split(key, 2 * num_layers + 2)
    for l in range(num_layers):
        in_dim = input_size if l == 0 else H
        w_ih = jax.random.uniform(keys[2 * l], (4 * H, in_dim),
                                  minval=-stdev, maxval=stdev, dtype=jnp.float32)
        w_hh = jax.random.uniform(keys[2 * l + 1], (4 * H, H),
                                  minval=-stdev, maxval=stdev, dtype=jnp.float32)
        b_ih = jnp.zeros((4 * H,), jnp.float32)   # module zero-inits all biases
        b_hh = jnp.zeros((4 * H,), jnp.float32)
        raw.append((w_ih, w_hh, b_ih, b_hh))
    seed1 = jax.random.normal(keys[-2], (num_layers, 1, H), dtype=jnp.float32) * 0.05
    seed2 = jax.random.normal(keys[-1], (num_layers, 1, H), dtype=jnp.float32) * 0.05
    return raw, seed1, seed2


def prepare_params(raw_params, batch, weight_dtype=jnp.bfloat16):
    """Pre-transpose weights (x @ W on MXU), optionally cast to bf16 for cheaper weight
    DMA / native bf16 MXU (v6e/v7x), and pre-broadcast the combined bias to (B, 4H)."""
    prepared = []
    for (w_ih, w_hh, b_ih, b_hh) in raw_params:
        bias = jnp.broadcast_to((b_ih + b_hh)[None, :], (batch, b_ih.shape[0]))
        bias = jnp.asarray(bias, jnp.float32)
        prepared.append((w_ih.T.astype(weight_dtype),
                         w_hh.T.astype(weight_dtype),
                         bias))
    return prepared


def _controller_seq_ref(x_seq, h0, c0, params):
    """Pure-JAX reference with the identical numeric recipe (for validation)."""
    h, c = h0, c0
    ys = []
    for t in range(x_seq.shape[0]):
        x = x_seq[t]
        h_new, c_new = [], []
        for l, (w_ih_t, w_hh_t, b) in enumerate(params):
            gates = (jnp.dot(x.astype(w_ih_t.dtype), w_ih_t,
                             preferred_element_type=jnp.float32)
                     + jnp.dot(h[l].astype(w_hh_t.dtype), w_hh_t,
                               preferred_element_type=jnp.float32)
                     + b)
            i, f, g, o = jnp.split(gates, 4, axis=-1)
            i, f, o = jax.nn.sigmoid(i), jax.nn.sigmoid(f), jax.nn.sigmoid(o)
            g = jnp.tanh(g)
            cl = f * c[l] + i * g
            hl = o * jnp.tanh(cl)
            h_new.append(hl)
            c_new.append(cl)
            x = hl
        h, c = jnp.stack(h_new), jnp.stack(c_new)
        ys.append(x)
    return jnp.stack(ys), (h, c)


# ------------------------------------------------------------------------------- main --
if __name__ == "__main__":
    input_size, hidden, num_layers, batch, T = 16, 32, 2, 8, 6

    key = jax.random.PRNGKey(0)
    kp, kx = jax.random.split(key)
    raw_params, seed1, seed2 = init_controller_params(kp, input_size, hidden, num_layers)

    def make_state():
        # reset(batch): repeat the seeds over the batch dimension (fresh buffers, since
        # the kernel donates the state via input_output_aliases).
        h0 = (jnp.broadcast_to(seed1, (num_layers, batch, hidden)) + 0.0).astype(jnp.float32)
        c0 = (jnp.broadcast_to(seed2, (num_layers, batch, hidden)) + 0.0).astype(jnp.float32)
        return h0, c0

    x_seq = jax.random.normal(kx, (T, batch, input_size), dtype=jnp.float32)

    # ---- f32 weights: exact module semantics -------------------------------------------
    params_f32 = prepare_params(raw_params, batch, jnp.float32)
    h0r, c0r = make_state()
    y_ref32, (h_ref32, c_ref32) = _controller_seq_ref(x_seq, h0r, c0r, params_f32)

    h0, c0 = make_state()
    y32, (h32, c32) = controller_forward_seq(x_seq, h0, c0, params_f32)
    jax.block_until_ready((y32, h32, c32))
    assert y32.shape == (T, batch, hidden)
    assert h32.shape == (num_layers, batch, hidden)
    assert c32.shape == (num_layers, batch, hidden)
    assert jnp.allclose(y32, y_ref32, atol=1e-4, rtol=1e-4)
    assert jnp.allclose(h32, h_ref32, atol=1e-4, rtol=1e-4)
    assert jnp.allclose(c32, c_ref32, atol=1e-4, rtol=1e-4)

    # ---- bf16-stored weights (v6e/v7x DMA-saving path), matched-recipe reference -------
    params_bf16 = prepare_params(raw_params, batch, jnp.bfloat16)
    h0r, c0r = make_state()
    y_refb, (h_refb, c_refb) = _controller_seq_ref(x_seq, h0r, c0r, params_bf16)

    h0, c0 = make_state()
    yb, (hb, cb) = controller_forward_seq(x_seq, h0, c0, params_bf16)
    jax.block_until_ready((yb, hb, cb))
    assert jnp.allclose(yb, y_refb, atol=1e-2, rtol=1e-2)
    assert jnp.allclose(hb, h_refb, atol=1e-2, rtol=1e-2)
    assert jnp.allclose(cb, c_refb, atol=1e-2, rtol=1e-2)

    # ---- single forward() call (T == 1), exactly the module's forward semantics --------
    h0, c0 = make_state()
    out1, (h1, c1) = controller_forward(x_seq[0], h0, c0, params_f32)
    jax.block_until_ready((out1, h1, c1))
    assert out1.shape == (batch, hidden)
    assert jnp.allclose(out1, y_ref32[0], atol=1e-4, rtol=1e-4)

    print("KERNEL_OK")
</pallas_src>

<mosaic_0001>
module attributes {stable_mosaic.version = 11 : i64} {
  func.func @_controller_seq_kernel(%arg0: i32, %arg1: memref<1x8x16xf32, #tpu.memory_space<vmem>>, %arg2: memref<2x8x32xf32, #tpu.memory_space<vmem>>, %arg3: memref<2x8x32xf32, #tpu.memory_space<vmem>>, %arg4: memref<16x128xf32, #tpu.memory_space<vmem>>, %arg5: memref<32x128xf32, #tpu.memory_space<vmem>>, %arg6: memref<8x128xf32, #tpu.memory_space<vmem>>, %arg7: memref<32x128xf32, #tpu.memory_space<vmem>>, %arg8: memref<32x128xf32, #tpu.memory_space<vmem>>, %arg9: memref<8x128xf32, #tpu.memory_space<vmem>>, %arg10: memref<1x8x32xf32, #tpu.memory_space<vmem>>, %arg11: memref<2x8x32xf32, #tpu.memory_space<vmem>>, %arg12: memref<2x8x32xf32, #tpu.memory_space<vmem>>) attributes {dimension_semantics = [#tpu.dimension_semantics<arbitrary>], iteration_bounds = array<i64: 6>, scalar_prefetch = 0 : i64, scratch_operands = 0 : i64, tpu.core_type = #tpu.core_type<tc>, window_params = [{transform_indices = @transform_0, window_bounds = array<i64: 1, 8, 16>}, {pipeline_mode = #tpu.pipeline_mode<synchronous>, transform_indices = @transform_1, window_bounds = array<i64: 2, 8, 32>}, {pipeline_mode = #tpu.pipeline_mode<synchronous>, transform_indices = @transform_2, window_bounds = array<i64: 2, 8, 32>}, {pipeline_mode = #tpu.pipeline_mode<synchronous>, transform_indices = @transform_3, window_bounds = array<i64: 16, 128>}, {pipeline_mode = #tpu.pipeline_mode<synchronous>, transform_indices = @transform_4, window_bounds = array<i64: 32, 128>}, {pipeline_mode = #tpu.pipeline_mode<synchronous>, transform_indices = @transform_5, window_bounds = array<i64: 8, 128>}, {pipeline_mode = #tpu.pipeline_mode<synchronous>, transform_indices = @transform_6, window_bounds = array<i64: 32, 128>}, {pipeline_mode = #tpu.pipeline_mode<synchronous>, transform_indices = @transform_7, window_bounds = array<i64: 32, 128>}, {pipeline_mode = #tpu.pipeline_mode<synchronous>, transform_indices = @transform_8, window_bounds = array<i64: 8, 128>}, {transform_indices = @transform_9, window_bounds = array<i64: 1, 8, 32>}, {pipeline_mode = #tpu.pipeline_mode<synchronous>, transform_indices = @transform_10, window_bounds = array<i64: 2, 8, 32>}, {pipeline_mode = #tpu.pipeline_mode<synchronous>, transform_indices = @transform_11, window_bounds = array<i64: 2, 8, 32>}]} {
    %c0_i32 = arith.constant 0 : i32
    %0 = arith.cmpi eq, %arg0, %c0_i32 : i32
    %1 = arith.extui %0 : i1 to i32
    %c0_i32_0 = arith.constant 0 : i32
    %2 = arith.cmpi ne, %1, %c0_i32_0 : i32
    scf.if %2 {
      %c0_46 = arith.constant 0 : index
      %c0_47 = arith.constant 0 : index
      %c0_48 = arith.constant 0 : index
      %72 = vector.load %arg2[%c0_46, %c0_47, %c0_48] : memref<2x8x32xf32, #tpu.memory_space<vmem>>, vector<2x8x32xf32>
      %c0_49 = arith.constant 0 : index
      %c0_50 = arith.constant 0 : index
      %c0_51 = arith.constant 0 : index
      %73 = vector.load %arg11[%c0_49, %c0_50, %c0_51] : memref<2x8x32xf32, #tpu.memory_space<vmem>>, vector<2x8x32xf32>
      tpu.vector_store %arg11[%c0_49, %c0_50, %c0_51], %72 {strides = array<i32>} : memref<2x8x32xf32, #tpu.memory_space<vmem>>, vector<2x8x32xf32>,
      %c0_52 = arith.constant 0 : index
      %c0_53 = arith.constant 0 : index
      %c0_54 = arith.constant 0 : index
      %74 = vector.load %arg3[%c0_52, %c0_53, %c0_54] : memref<2x8x32xf32, #tpu.memory_space<vmem>>, vector<2x8x32xf32>
      %c0_55 = arith.constant 0 : index
      %c0_56 = arith.constant 0 : index
      %c0_57 = arith.constant 0 : index
      %75 = vector.load %arg12[%c0_55, %c0_56, %c0_57] : memref<2x8x32xf32, #tpu.memory_space<vmem>>, vector<2x8x32xf32>
      tpu.vector_store %arg12[%c0_55, %c0_56, %c0_57], %74 {strides = array<i32>} : memref<2x8x32xf32, #tpu.memory_space<vmem>>, vector<2x8x32xf32>,
    } else {
    }
    %c0 = arith.constant 0 : index
    %c0_1 = arith.constant 0 : index
    %3 = vector.load %arg5[%c0, %c0_1] : memref<32x128xf32, #tpu.memory_space<vmem>>, vector<32x128xf32>
    %c0_2 = arith.constant 0 : index
    %c0_3 = arith.constant 0 : index
    %c0_4 = arith.constant 0 : index
    %4 = vector.load %arg11[%c0_2, %c0_3, %c0_4] : memref<2x8x32xf32, #tpu.memory_space<vmem>>, vector<1x8x32xf32>
    %5 = vector.shape_cast %4 : vector<1x8x32xf32> to vector<8x32xf32>
    %cst = arith.constant dense<0.000000e+00> : vector<8x128xf32>
    %6 = tpu.matmul %5, %3, %cst {dimension_numbers = #tpu.dot_dimension_numbers<[1], [0], [0], [1], [0, 0, 1, 1], [], []>} : vector<8x32xf32>, vector<32x128xf32>, vector<8x128xf32> -> vector<8x128xf32>
    %c0_5 = arith.constant 0 : index
    %c0_6 = arith.constant 0 : index
    %7 = vector.load %arg8[%c0_5, %c0_6] : memref<32x128xf32, #tpu.memory_space<vmem>>, vector<32x128xf32>
    %c1 = arith.constant 1 : index
    %c0_7 = arith.constant 0 : index
    %c0_8 = arith.constant 0 : index
    %8 = vector.load %arg11[%c1, %c0_7, %c0_8] : memref<2x8x32xf32, #tpu.memory_space<vmem>>, vector<1x8x32xf32>
    %9 = vector.shape_cast %8 : vector<1x8x32xf32> to vector<8x32xf32>
    %cst_9 = arith.constant dense<0.000000e+00> : vector<8x128xf32>
    %10 = tpu.matmul %9, %7, %cst_9 {dimension_numbers = #tpu.dot_dimension_numbers<[1], [0], [0], [1], [0, 0, 1, 1], [], []>} : vector<8x32xf32>, vector<32x128xf32>, vector<8x128xf32> -> vector<8x128xf32>
    %c0_10 = arith.constant 0 : index
    %c0_11 = arith.constant 0 : index
    %c0_12 = arith.constant 0 : index
    %11 = vector.load %arg1[%c0_10, %c0_11, %c0_12] : memref<1x8x16xf32, #tpu.memory_space<vmem>>, vector<1x8x16xf32>
    %12 = vector.shape_cast %11 : vector<1x8x16xf32> to vector<8x16xf32>
    %c0_13 = arith.constant 0 : index
    %c0_14 = arith.constant 0 : index
    %13 = vector.load %arg4[%c0_13, %c0_14] : memref<16x128xf32, #tpu.memory_space<vmem>>, vector<16x128xf32>
    %c0_15 = arith.constant 0 : index
    %c0_16 = arith.constant 0 : index
    %14 = vector.load %arg6[%c0_15, %c0_16] : memref<8x128xf32, #tpu.memory_space<vmem>>, vector<8x128xf32>
    %cst_17 = arith.constant dense<0.000000e+00> : vector<8x128xf32>
    %15 = tpu.matmul %12, %13, %cst_17 {dimension_numbers = #tpu.dot_dimension_numbers<[1], [0], [0], [1], [0, 0, 1, 1], [], []>} : vector<8x16xf32>, vector<16x128xf32>, vector<8x128xf32> -> vector<8x128xf32>
    %16 = arith.addf %15, %6 : vector<8x128xf32>
    %17 = arith.addf %16, %14 : vector<8x128xf32>
    %18 = arith.negf %17 : vector<8x128xf32>
    %19 = math.exp %18 : vector<8x128xf32>
    %cst_18 = arith.constant 1.000000e+00 : f32
    %20 = vector.broadcast %cst_18 : f32 to vector<8x128xf32>
    %21 = arith.addf %20, %19 : vector<8x128xf32>
    %22 = arith.divf %20, %21 : vector<8x128xf32>
    %23 = math.tanh %17 : vector<8x128xf32>
    %24 = vector.extract_strided_slice %22 {offsets = [0, 0], sizes = [8, 32], strides = [1, 1]} : vector<8x128xf32> to vector<8x32xf32>
    %25 = vector.extract_strided_slice %22 {offsets = [0, 32], sizes = [8, 32], strides = [1, 1]} : vector<8x128xf32> to vector<8x32xf32>
    %26 = vector.extract_strided_slice %23 {offsets = [0, 64], sizes = [8, 32], strides = [1, 1]} : vector<8x128xf32> to vector<8x32xf32>
    %27 = vector.extract_strided_slice %22 {offsets = [0, 96], sizes = [8, 32], strides = [1, 1]} : vector<8x128xf32> to vector<8x32xf32>
    %c0_19 = arith.constant 0 : index
    %c0_20 = arith.constant 0 : index
    %c0_21 = arith.constant 0 : index
    %28 = vector.load %arg12[%c0_19, %c0_20, %c0_21] : memref<2x8x32xf32, #tpu.memory_space<vmem>>, vector<1x8x32xf32>
    %29 = vector.shape_cast %28 : vector<1x8x32xf32> to vector<8x32xf32>
    %30 = arith.mulf %25, %29 : vector<8x32xf32>
    %31 = arith.mulf %24, %26 : vector<8x32xf32>
    %32 = arith.addf %30, %31 : vector<8x32xf32>
    %33 = math.tanh %32 : vector<8x32xf32>
    %34 = arith.mulf %27, %33 : vector<8x32xf32>
    %c0_22 = arith.constant 0 : index
    %c0_23 = arith.constant 0 : index
    %c0_24 = arith.constant 0 : index
    %35 = vector.load %arg11[%c0_22, %c0_23, %c0_24] : memref<2x8x32xf32, #tpu.memory_space<vmem>>, vector<1x8x32xf32>
    %36 = vector.shape_cast %35 : vector<1x8x32xf32> to vector<8x32xf32>
    %37 = vector.shape_cast %34 : vector<8x32xf32> to vector<1x8x32xf32>
    tpu.vector_store %arg11[%c0_22, %c0_23, %c0_24], %37 {strides = array<i32>} : memref<2x8x32xf32, #tpu.memory_space<vmem>>, vector<1x8x32xf32>,
    %c0_25 = arith.constant 0 : index
    %c0_26 = arith.constant 0 : index
    %c0_27 = arith.constant 0 : index
    %38 = vector.load %arg12[%c0_25, %c0_26, %c0_27] : memref<2x8x32xf32, #tpu.memory_space<vmem>>, vector<1x8x32xf32>
    %39 = vector.shape_cast %38 : vector<1x8x32xf32> to vector<8x32xf32>
    %40 = vector.shape_cast %32 : vector<8x32xf32> to vector<1x8x32xf32>
    tpu.vector_store %arg12[%c0_25, %c0_26, %c0_27], %40 {strides = array<i32>} : memref<2x8x32xf32, #tpu.memory_space<vmem>>, vector<1x8x32xf32>,
    %c0_28 = arith.constant 0 : index
    %c0_29 = arith.constant 0 : index
    %41 = vector.load %arg7[%c0_28, %c0_29] : memref<32x128xf32, #tpu.memory_space<vmem>>, vector<32x128xf32>
    %c0_30 = arith.constant 0 : index
    %c0_31 = arith.constant 0 : index
    %42 = vector.load %arg9[%c0_30, %c0_31] : memref<8x128xf32, #tpu.memory_space<vmem>>, vector<8x128xf32>
    %cst_32 = arith.constant dense<0.000000e+00> : vector<8x128xf32>
    %43 = tpu.matmul %34, %41, %cst_32 {dimension_numbers = #tpu.dot_dimension_numbers<[1], [0], [0], [1], [0, 0, 1, 1], [], []>} : vector<8x32xf32>, vector<32x128xf32>, vector<8x128xf32> -> vector<8x128xf32>
    %44 = arith.addf %43, %10 : vector<8x128xf32>
    %45 = arith.addf %44, %42 : vector<8x128xf32>
    %46 = arith.negf %45 : vector<8x128xf32>
    %47 = math.exp %46 : vector<8x128xf32>
    %cst_33 = arith.constant 1.000000e+00 : f32
    %48 = vector.broadcast %cst_33 : f32 to vector<8x128xf32>
    %49 = arith.addf %48, %47 : vector<8x128xf32>
    %50 = arith.divf %48, %49 : vector<8x128xf32>
    %51 = math.tanh %45 : vector<8x128xf32>
    %52 = vector.extract_strided_slice %50 {offsets = [0, 0], sizes = [8, 32], strides = [1, 1]} : vector<8x128xf32> to vector<8x32xf32>
    %53 = vector.extract_strided_slice %50 {offsets = [0, 32], sizes = [8, 32], strides = [1, 1]} : vector<8x128xf32> to vector<8x32xf32>
    %54 = vector.extract_strided_slice %51 {offsets = [0, 64], sizes = [8, 32], strides = [1, 1]} : vector<8x128xf32> to vector<8x32xf32>
    %55 = vector.extract_strided_slice %50 {offsets = [0, 96], sizes = [8, 32], strides = [1, 1]} : vector<8x128xf32> to vector<8x32xf32>
    %c1_34 = arith.constant 1 : index
    %c0_35 = arith.constant 0 : index
    %c0_36 = arith.constant 0 : index
    %56 = vector.load %arg12[%c1_34, %c0_35, %c0_36] : memref<2x8x32xf32, #tpu.memory_space<vmem>>, vector<1x8x32xf32>
    %57 = vector.shape_cast %56 : vector<1x8x32xf32> to vector<8x32xf32>
    %58 = arith.mulf %53, %57 : vector<8x32xf32>
    %59 = arith.mulf %52, %54 : vector<8x32xf32>
    %60 = arith.addf %58, %59 : vector<8x32xf32>
    %61 = math.tanh %60 : vector<8x32xf32>
    %62 = arith.mulf %55, %61 : vector<8x32xf32>
    %c1_37 = arith.constant 1 : index
    %c0_38 = arith.constant 0 : index
    %c0_39 = arith.constant 0 : index
    %63 = vector.load %arg11[%c1_37, %c0_38, %c0_39] : memref<2x8x32xf32, #tpu.memory_space<vmem>>, vector<1x8x32xf32>
    %64 = vector.shape_cast %63 : vector<1x8x32xf32> to vector<8x32xf32>
    %65 = vector.shape_cast %62 : vector<8x32xf32> to vector<1x8x32xf32>
    tpu.vector_store %arg11[%c1_37, %c0_38, %c0_39], %65 {strides = array<i32>} : memref<2x8x32xf32, #tpu.memory_space<vmem>>, vector<1x8x32xf32>,
    %c1_40 = arith.constant 1 : index
    %c0_41 = arith.constant 0 : index
    %c0_42 = arith.constant 0 : index
    %66 = vector.load %arg12[%c1_40, %c0_41, %c0_42] : memref<2x8x32xf32, #tpu.memory_space<vmem>>, vector<1x8x32xf32>
    %67 = vector.shape_cast %66 : vector<1x8x32xf32> to vector<8x32xf32>
    %68 = vector.shape_cast %60 : vector<8x32xf32> to vector<1x8x32xf32>
    tpu.vector_store %arg12[%c1_40, %c0_41, %c0_42], %68 {strides = array<i32>} : memref<2x8x32xf32, #tpu.memory_space<vmem>>, vector<1x8x32xf32>,
    %c0_43 = arith.constant 0 : index
    %c0_44 = arith.constant 0 : index
    %c0_45 = arith.constant 0 : index
    %69 = vector.load %arg10[%c0_43, %c0_44, %c0_45] : memref<1x8x32xf32, #tpu.memory_space<vmem>>, vector<1x8x32xf32>
    %70 = vector.shape_cast %69 : vector<1x8x32xf32> to vector<8x32xf32>
    %71 = vector.shape_cast %62 : vector<8x32xf32> to vector<1x8x32xf32>
    tpu.vector_store %arg10[%c0_43, %c0_44, %c0_45], %71 {strides = array<i32>} : memref<1x8x32xf32, #tpu.memory_space<vmem>>, vector<1x8x32xf32>,
    return
  }
  func.func @transform_0(%arg0: i32) -> (i32, i32, i32) {
    %c0_i32 = arith.constant 0 : i32
    %c0_i32_0 = arith.constant 0 : i32
    %c0_i32_1 = arith.constant 0 : i32
    return %arg0, %c0_i32, %c0_i32_0 : i32, i32, i32
  }
  func.func @transform_1(%arg0: i32) -> (i32, i32, i32) {
    %c0_i32 = arith.constant 0 : i32
    %c0_i32_0 = arith.constant 0 : i32
    %c0_i32_1 = arith.constant 0 : i32
    %c0_i32_2 = arith.constant 0 : i32
    return %c0_i32, %c0_i32_0, %c0_i32_1 : i32, i32, i32
  }
  func.func @transform_2(%arg0: i32) -> (i32, i32, i32) {
    %c0_i32 = arith.constant 0 : i32
    %c0_i32_0 = arith.constant 0 : i32
    %c0_i32_1 = arith.constant 0 : i32
    %c0_i32_2 = arith.constant 0 : i32
    return %c0_i32, %c0_i32_0, %c0_i32_1 : i32, i32, i32
  }
  func.func @transform_3(%arg0: i32) -> (i32, i32) {
    %c0_i32 = arith.constant 0 : i32
    %c0_i32_0 = arith.constant 0 : i32
    %c0_i32_1 = arith.constant 0 : i32
    return %c0_i32, %c0_i32_0 : i32, i32
  }
  func.func @transform_4(%arg0: i32) -> (i32, i32) {
    %c0_i32 = arith.constant 0 : i32
    %c0_i32_0 = arith.constant 0 : i32
    %c0_i32_1 = arith.constant 0 : i32
    return %c0_i32, %c0_i32_0 : i32, i32
  }
  func.func @transform_5(%arg0: i32) -> (i32, i32) {
    %c0_i32 = arith.constant 0 : i32
    %c0_i32_0 = arith.constant 0 : i32
    %c0_i32_1 = arith.constant 0 : i32
    return %c0_i32, %c0_i32_0 : i32, i32
  }
  func.func @transform_6(%arg0: i32) -> (i32, i32) {
    %c0_i32 = arith.constant 0 : i32
    %c0_i32_0 = arith.constant 0 : i32
    %c0_i32_1 = arith.constant 0 : i32
    return %c0_i32, %c0_i32_0 : i32, i32
  }
  func.func @transform_7(%arg0: i32) -> (i32, i32) {
    %c0_i32 = arith.constant 0 : i32
    %c0_i32_0 = arith.constant 0 : i32
    %c0_i32_1 = arith.constant 0 : i32
    return %c0_i32, %c0_i32_0 : i32, i32
  }
  func.func @transform_8(%arg0: i32) -> (i32, i32) {
    %c0_i32 = arith.constant 0 : i32
    %c0_i32_0 = arith.constant 0 : i32
    %c0_i32_1 = arith.constant 0 : i32
    return %c0_i32, %c0_i32_0 : i32, i32
  }
  func.func @transform_9(%arg0: i32) -> (i32, i32, i32) {
    %c0_i32 = arith.constant 0 : i32
    %c0_i32_0 = arith.constant 0 : i32
    %c0_i32_1 = arith.constant 0 : i32
    return %arg0, %c0_i32, %c0_i32_0 : i32, i32, i32
  }
  func.func @transform_10(%arg0: i32) -> (i32, i32, i32) {
    %c0_i32 = arith.constant 0 : i32
    %c0_i32_0 = arith.constant 0 : i32
    %c0_i32_1 = arith.constant 0 : i32
    %c0_i32_2 = arith.constant 0 : i32
    return %c0_i32, %c0_i32_0, %c0_i32_1 : i32, i32, i32
  }
  func.func @transform_11(%arg0: i32) -> (i32, i32, i32) {
    %c0_i32 = arith.constant 0 : i32
    %c0_i32_0 = arith.constant 0 : i32
    %c0_i32_1 = arith.constant 0 : i32
    %c0_i32_2 = arith.constant 0 : i32
    return %c0_i32, %c0_i32_0, %c0_i32_1 : i32, i32, i32
  }
}

</mosaic_0001>

<bundles_post_ra>
// kernel: tpu_custom_call.1
= control target key start
LH: loop header
LB: loop body
LE: loop exit
PB: predicated region body
PF: predicated region fallthrough
CT: control target
= control target key end

     0   :  { %s1768_s0 = inlined_call_operand.hbm [shape: f32[6,8,16], index: 0, kind: input, shape index: {}]   ;;  %s1769_s1 = inlined_call_operand.hbm [shape: f32[2,8,32], index: 1, kind: input, shape index: {}, may-alias: {1,10}]   ;;  %s1770_s2 = inlined_call_operand.hbm [shape: f32[2,8,32], index: 2, kind: input, shape index: {}, may-alias: {2,11}]   ;;  %s1771_s3 = inlined_call_operand.vmem [shape: f32[16,128], index: 3, kind: input, shape index: {}]   ;;  %s1772_s4 = inlined_call_operand.vmem [shape: f32[32,128], index: 4, kind: input, shape index: {}]   ;;  %s1773_s5 = inlined_call_operand.hbm [shape: f32[8,128], index: 5, kind: input, shape index: {}]   ;;  %s1774_s6 = inlined_call_operand.hbm [shape: f32[32,128], index: 6, kind: input, shape index: {}]   ;;  %s1775_s7 = inlined_call_operand.hbm [shape: f32[32,128], index: 7, kind: input, shape index: {}]   ;;  %s1776_s8 = inlined_call_operand.hbm [shape: f32[8,128], index: 8, kind: input, shape index: {}]   ;;  %s1777_s9 = inlined_call_operand.hbm [shape: f32[6,8,32], index: 9, kind: output, shape index: {0}]   ;;  %s1778_s10 = inlined_call_operand.hbm [shape: f32[2,8,32], index: 10, kind: output, shape index: {1}, may-alias: {1,10}]   ;;  %s1779_s11 = inlined_call_operand.hbm [shape: f32[2,8,32], index: 11, kind: output, shape index: {2}, may-alias: {2,11}]  }
   0x1   :  { %1781 = sst [smem:[#allocation24_spill]] %s1768_s0 }
   0x2   :  { %1782 = sst [smem:[#allocation25_spill]] %s1769_s1 }
   0x3   :  { %1783 = sst [smem:[#allocation26_spill]] %s1770_s2 }
   0x4   :  { %1784 = sst [smem:[#allocation27_spill]] %s1771_s3 }
   0x5   :  { %1785 = sst [smem:[#allocation28_spill]] %s1773_s5 }
   0x6   :  { %1786 = sst [smem:[#allocation29_spill]] %s1774_s6 }
   0x7   :  { %1787 = sst [smem:[#allocation30_spill]] %s1775_s7 }
   0x8   :  { %1788 = sst [smem:[#allocation31_spill]] %s1779_s11 }
   0x9   :  { %17 = vsyncpa [#allocation3], 0 }
   0xa   :  { %19 = vsyncpa [#allocation3 + $0x1], 0 }
   0xb   :  { %20 = vsyncpa [#allocation6], 0 }
   0xc   :  { %21 = vsyncpa [#allocation9], 0 }
   0xd   :  { %22 = vsyncpa [#allocation12], 0 }
   0xe   :  { %23 = vsyncpa [#allocation4], 0 }
   0xf   :  { %25 = vsyncpa [#allocation4 + $0x1], 0 }
  0x10   :  { %26 = vsyncpa [#allocation16], 0  ;;  %s1527_s17 = smov 0   ;;  %s1529_s18 = smov 0  }
  0x11   :  { %s1531_s19 = smov 0   ;;  %s1533_s20 = smov 0  }
  0x12 LB: > { %s1789_s1 = sld [smem:[#allocation25_spill]]  ;;  %s1551_s24 = sadd.s32 4294967295, %s1450_s20   ;;  %s1450_s20 = sphi %s1533_s20, %s1812_s20   ;;  %s1446_s19 = sphi %s1531_s19, %s1811_s19   ;;  %s1442_s18 = sphi %s1529_s18, %s1810_s18   ;;  %s1438_s17 = sphi %s1527_s17, %s1809_s17  }
  0x13   : > { %p924_p0 = scmp.ge.s32.totalorder %s1450_s20, 1  ;;  %p53_p1 = scmp.eq.s32.totalorder %s1551_s24, 0 }
  0x14   : > { %p299_p2 = scmp.lt.s32.totalorder %s1450_s20, 7  ;;  %s1452_s26 = smov [#allocation5]  }
  0x15   : > { %s312_s27 = sshll.u32 %s1452_s26, 4  ;;  %s1791_s5 = sld [smem:[#allocation28_spill]]  ;;  %s313_s27 = int_to_ptr.vmem [resolvable:$true] %s312_s27 }
  0x16   : > { %p1557_p4 = pnand %p924_p0, %p299_p2  ;;  %s1793_s7 = sld [smem:[#allocation30_spill]] }
  0x17   : > { %s1453_s16 = smov [#allocation8]   ;;  %s1454_s22 = smov 128  }
  0x18   : > { %s310_s23 = sshll.u32 %s1789_s1, 4  ;;  %p994_p5 = pneg %p1557_p4  ;;  %s311_s23 = int_to_ptr.hbm [resolvable:$true] %s310_s23 }
  0x19   : > { %s347_s21 = sshll.u32 %s1453_s16, 4  ;;  %s1455_s26 = smov 8   ;;  %s348_s21 = int_to_ptr.vmem [resolvable:$true] %s347_s21 }
  0x1a   : > { %p1568_p6 = pnand %p994_p5, %p53_p1  ;;  %s1794_s2 = sld [smem:[#allocation26_spill]] }
  0x1b   : > { %s345_s30 = sshll.u32 %s1791_s5, 4  ;;  %s1456_s5 = smov [#allocation11]   ;;  %s346_s30 = int_to_ptr.hbm [resolvable:$true] %s345_s30 }
  0x1c   : > { %s370_s15 = sshll.u32 %s1793_s7, 4  ;;  %s372_s11 = sshll.u32 %s1456_s5, 4  ;;  %s371_s15 = int_to_ptr.hbm [resolvable:$true] %s370_s15  ;;  %s373_s11 = int_to_ptr.vmem [resolvable:$true] %s372_s11 }
  0x1d   : > { %997 = dma.hbm_to_vmem [thread:$0]  (!%p1568_p6), %s311_s23, 256, %s313_s27, [#allocation6], %s1454_s22, %s1454_s22, %s1455_s26  }
  0x1e   : > { %1003 = dma.hbm_to_vmem [thread:$0]  (!%p1568_p6), %s346_s30, 128, %s348_s21, [#allocation9]  }
  0x1f   : > { %1009 = dma.hbm_to_vmem [thread:$0]  (!%p1568_p6), %s371_s15, 512, %s373_s11, [#allocation12], %s1454_s22, %s1454_s22, %s1455_s26  }
  0x20   : > { %s324_s1 = sshll.u32 %s1794_s2, 4  ;;  %s1457_s13 = smov [#allocation7]   ;;  %s325_s1 = int_to_ptr.hbm [resolvable:$true] %s324_s1 }
  0x21   : > { %s326_s14 = sshll.u32 %s1457_s13, 4  ;;  %s1795_s6 = sld [smem:[#allocation29_spill]]  ;;  %s327_s14 = int_to_ptr.vmem [resolvable:$true] %s326_s14 }
  0x22   : > { %1000 = dma.hbm_to_vmem [thread:$0]  (!%p1568_p6), %s325_s1, 256, %s327_s14, [#allocation6], %s1454_s22, %s1454_s22, %s1455_s26  }
  0x23   : > { %s385_s11 = sshll.u32 %s1776_s8, 4  ;;  %s1458_s15 = smov [#allocation10]   ;;  %s386_s11 = int_to_ptr.hbm [resolvable:$true] %s385_s11 }
  0x24   : > { %s358_s21 = sshll.u32 %s1458_s15, 4  ;;  %s1459_s28 = smov [#allocation13]   ;;  %s359_s21 = int_to_ptr.vmem [resolvable:$true] %s358_s21 }
  0x25   : > { %s387_s1 = sshll.u32 %s1459_s28, 4  ;;  %s923_s29 = sadd.s32 4294967294, %s1450_s20   ;;  %s388_s1 = int_to_ptr.vmem [resolvable:$true] %s387_s1 }
  0x26   : > { %1012 = dma.hbm_to_vmem [thread:$0]  (!%p1568_p6), %s386_s11, 128, %s388_s1, [#allocation12]  }
  0x27   : > { %s356_s30 = sshll.u32 %s1795_s6, 4  ;;  %s1598_s13 = sadd.s32 1, %s1450_s20   ;;  %s357_s30 = int_to_ptr.hbm [resolvable:$true] %s356_s30 }
  0x28   : > { %1006 = dma.hbm_to_vmem [thread:$0]  (!%p1568_p6), %s357_s30, 512, %s359_s21, [#allocation9], %s1454_s22, %s1454_s22, %s1455_s26  }
  0x29   : > { %s36_s14 = ssub.s32 %s1450_s20, %s1598_s13  ;;  %s39_s23 = sadd.s32 1, %s1446_s19 }
  0x2a   : > { %p37_p7 = scmp.eq.s32.totalorder %s36_s14, 0  ;;  %p46_p8 = scmp.ne.s32.totalorder %s1446_s19, %s1442_s18 }
  0x2b   : > { %p47_p9 = scmp.eq.s32.totalorder %s1450_s20, 0  ;;  %p52_p10 = scmp.ne.s32.totalorder %s1442_s18, %s1438_s17 }
  0x2c   : > { %s1609_s22 = scalar_select %p37_p7, %s1446_s19, %s39_s23  }
  0x2d   : > { %p1611_p11 = por %p47_p9, %p46_p8  ;;  %p1617_p12 = por %p53_p1, %p52_p10 }
  0x2e   : > { %p1780_p13 = scmp.eq.s32.totalorder %s1551_s24, 5  ;;  %p250_p0 = scmp.eq.s32.totalorder %s923_s29, 5 }
  0x2f   : > { %p1027_p2 = scmp.lt.s32.totalorder %s1450_s20, 6  ;;  %s398_s27 = sand.u32 1, %s1446_s19  }
  0x30   : > { %p1626_p5 = por %p1780_p13, %p46_p8  ;;  %p1630_p6 = por %p250_p0, %p52_p10 }
  0x31   : > { %s932_s16 = sshll.u32 %s398_s27, 3  ;;  %s933_s11 = sshll.u32 %s1450_s20, 3 }
  0x32   : > { %s1800_s0 = sld [smem:[#allocation24_spill]]  ;;  %s402_s1 = scalar_lea.vmem [#allocation2], %s932_s16 }
  0x33   : > { %s410_s14 = sshll.u32 %s402_s1, 4  ;;  %p1640_p7 = pnand %p1027_p2, %p1611_p11  ;;  %s411_s14 = int_to_ptr.vmem [resolvable:$true] %s410_s14 }
  0x34   : > { %s399_s2 = scalar_lea.sflag [#allocation3], %s398_s27 }
  0x35   : > { %p1286_p9 = pneg %p1640_p7 }
  0x38   : > { %s406_s28 = scalar_lea.hbm %s1800_s0, %s933_s11  ;;  %s1289_s15 = scalar_lea.hbm %s1800_s0, 48 }
  0x39   : > { %s408_s29 = sshll.u32 %s406_s28, 4  ;;  %s409_s29 = int_to_ptr.hbm [resolvable:$true] %s408_s29 }
  0x3a   : > { %s1282_s6 = sshra.s32 %s409_s29, 4  ;;  %s1283_s6 = int_to_ptr.hbm [resolvable:$true] %s1282_s6 }
  0x3b   : > { %s1284_s7 = scalar_lea.hbm %s1283_s6, 8  ;;  %p1290_p11 = scmp.lt.s32.totalorder %s1283_s6, %s1800_s0 }
  0x3c   : > { %p1285_p8 = scmp.ne.s32.totalorder %s1283_s6, %s1284_s7  ;;  %p1291_p2 = scmp.lt.s32.totalorder %s1289_s15, %s1284_s7 }
  0x3e   : > { %p1287_p10 = pnand %p1286_p9, %p1285_p8  ;;  %p1292_p13 = por %p1291_p2, %p1290_p11 }
  0x40   : > { %p1288_p0 = pneg %p1287_p10 }
  0x42   : > { %p1293_p3 = pnand %p1292_p13, %p1288_p0 }
  0x44   : > { %1296 = shalt.err (!%p1293_p3)
}
  0x45   : > { %1016 = dma.hbm_to_vmem [thread:$0]  (!%p1640_p7), %s409_s29, 128, %s411_s14, %s399_s2  }
  0x46   : > { %419 = sbr.rel (%p1557_p4) target bundleno = 1276 (0x4fc), region = 56  ;;  %s1657_s27 = sand.u32 (!%p1557_p4), 1, %s1442_s18  }
  0x47   : > { %s935_s28 = sshll.u32 (!%p1557_p4), %s1657_s27, 3  ;;  %s422_s1 = scalar_lea.sflag (!%p1557_p4), [#allocation3], %s1657_s27 }
  0x48   : > { %s425_s16 = scalar_lea.vmem (!%p1557_p4), [#allocation2], %s935_s28 }
  0x4b   : > { %1413 = dma.done.wait (%p1617_p12), %s422_s1, 128  }
  0x4c   : > { %1415 = vsyncadd (%p1617_p12), %s422_s1, 4294967168 }
  0x4d   : > { %1417 = dma.done.wait (%p53_p1), [#allocation6], 512  }
  0x4e   : > { %1419 = vsyncadd (%p53_p1), [#allocation6], 4294966784 }
  0x4f   : > { %1421 = dma.done.wait (%p53_p1), [#allocation9], 640  }
  0x50   : > { %1423 = vsyncadd (%p53_p1), [#allocation9], 4294966656 }
  0x51   : > { %1425 = dma.done.wait (%p53_p1), [#allocation12], 640  }
  0x52   : > { %1427 = vsyncadd (%p53_p1), [#allocation12], 4294966656  ;;  %s1677_s2 = scalar_lea.vmem [#allocation14], %s935_s28  ;;  %p1802_p3 = scmp.ne.s32.totalorder %s1551_s24, 0 }
  0x54   : > { %498 = sbr.rel (%p1802_p3) target bundleno = 94 (0x5e), region = 88 }
  0x59   : > { %v499_v0 = vld [vmem:[#allocation5] sm:$0xff]  ;;  %vm501_vm0 = vcmask 261120   ;;  %v500_v1 = vld [vmem:[#allocation5 + $0x8] sm:$0xff]  ;;  %v504_v2 = vld [vmem:[#allocation7] sm:$0xff] }
  0x5a   : > { %502 = vst.msk [vmem:[#allocation15] sm:$0xff] %vm501_vm0, %v499_v0  ;;  %v505_v3 = vld [vmem:[#allocation7 + $0x8] sm:$0xff] }
  0x5b   : > { %503 = vst.msk [vmem:[#allocation15 + $0x8] sm:$0xff] %vm501_vm0, %v500_v1 }
  0x5c   : > { %506 = vst.msk [vmem:[#allocation17] sm:$0xff] %vm501_vm0, %v504_v2 }
  0x5d   : > { %507 = vst.msk [vmem:[#allocation17 + $0x8] sm:$0xff] %vm501_vm0, %v505_v3 }
  0x5e PF: > { %s1803_s3 = sld [smem:[#allocation27_spill]]  ;;  %v511_v5 = vld [vmem:[%s1772_s4 + $0x18] sm:$0xff]  ;;  %v566_v7 = vld [vmem:[%s425_s16] sm:$0xff]  ;;  %vm570_vm1 = vcmask 130048   ;;  %v510_v8 = vld [vmem:[%s1772_s4 + $0x10] sm:$0xff]  ;;  %vm513_vm2 = vcmask 261120  }
  0x5f   : > { %529 = vmatpush.msra.mxu0 %v511_v5  ;;  %v509_v9 = vld [vmem:[%s1772_s4 + $0x8] sm:$0xff]  ;;  %v508_v10 = vld [vmem:[%s1772_s4] sm:$0xff]  ;;  %v569_v13 = vld [vmem:[#allocation8] sm:$0xff]  ;;  %s1460_s1 = smov 64   ;;  %s1461_s16 = smov 32  }
  0x60   : > { %v650_v39 = vld [vmem:[#allocation10 + $0x18] sm:$0xff]  ;;  %v649_v40 = vld [vmem:[#allocation10 + $0x10] sm:$0xff]  ;;  %v648_v42 = vld [vmem:[#allocation10 + $0x8] sm:$0xff]  ;;  %s1462_s6 = smov 96   ;;  %s951_s7 = sshll.u32 %s1551_s24, 3 }
  0x61   : > { %530 = vmatpush.msra.mxu0 %v510_v8  ;;  %v512_v11 = vld [vmem:[#allocation15] sm:$0xff]  ;;  %666 = vmatpush.msra.mxu3 %v650_v39  ;;  %v647_v43 = vld [vmem:[#allocation10] sm:$0xff]  ;;  %v539_v46 = vld [vmem:[#allocation11 + $0x10] sm:$0xff]  ;;  %s1463_s25 = smov [#allocation15]   ;;  %s755_s23 = sshll.u32 %s1778_s10, 4  ;;  %s756_s23 = int_to_ptr.hbm [resolvable:$true] %s755_s23 }
  0x62   : > { %v540_v41 = vld [vmem:[#allocation11 + $0x18] sm:$0xff]  ;;  %v538_v47 = vld [vmem:[#allocation11 + $0x8] sm:$0xff]  ;;  %v537_v49 = vld [vmem:[#allocation11] sm:$0xff]  ;;  %s753_s12 = sshll.u32 %s1463_s25, 4  ;;  %s740_s21 = scalar_lea.hbm %s1777_s9, %s951_s7  ;;  %s754_s12 = int_to_ptr.vmem [resolvable:$true] %s753_s12 }
  0x63   : > { %531 = vmatpush.msra.mxu0 %v509_v9  ;;  %v615_v18 = vld [vmem:[#allocation17] sm:$0xff]  ;;  %558 = vmatpush.msra.mxu1 %v540_v41  ;;  %v542_v50 = vld [vmem:[#allocation15 + $0x8] sm:$0xff]  ;;  %s742_s26 = sshll.u32 %s1677_s2, 4  ;;  %s744_s28 = sshll.u32 %s740_s21, 4  ;;  %s743_s26 = int_to_ptr.vmem [resolvable:$true] %s742_s26  ;;  %s745_s28 = int_to_ptr.hbm [resolvable:$true] %s744_s28 }
  0x64   : > { %v568_v4 = vld [vmem:[%s1803_s3 + $0x8] sm:$0xff]  ;;  %v567_v6 = vld [vmem:[%s1803_s3] sm:$0xff]  ;;  %667 = vmatpush.msra.mxu3 %v649_v40  ;;  %v651_v53 = vld [vmem:[#allocation13] sm:$0xff]  ;;  %s1804_s25 = sld [smem:[#allocation31_spill]]  ;;  %s1465_s7 = smov 128  }
  0x65   : > { %588 = vmatpush.msra.mxu2 %v568_v4  ;;  %532 = vmatpush.msra.mxu0 %v508_v10  ;;  %v696_v48 = vld [vmem:[#allocation17 + $0x8] sm:$0xff]  ;;  %s1466_s14 = smov 8   ;;  %p1805_p1 = scmp.eq.s32.totalorder %s1551_s24, 5 }
  0x66   : > { %944 = vmatmul.msk.f32.vlgmr.msra.gmra.mxu0 %vm513_vm2, %v512_v11  ;;  %668 = vmatpush.msra.mxu3 %v648_v42  ;;  %s730_s29 = scalar_lea.sflag [#allocation4], %s1657_s27  ;;  %s1354_s11 = sshra.s32 %s745_s28, 4  ;;  %s1355_s11 = int_to_ptr.hbm [resolvable:$true] %s1354_s11 }
  0x67   : > { %589 = vmatpush.msra.mxu2 %v567_v6  ;;  %559 = vmatpush.msra.mxu1 %v539_v46  ;;  %s1356_s0 = scalar_lea.hbm %s1355_s11, 8  ;;  %p1361_p7 = scmp.lt.s32.totalorder %s1355_s11, %s1777_s9 }
  0x68   : > { %946 = vmatmul.msk.f32.vlgmr.msra.gmra.mxu2 %vm570_vm1, %v566_v7  ;;  %669 = vmatpush.msra.mxu3 %v647_v43  ;;  %p1357_p4 = scmp.ne.s32.totalorder %s1355_s11, %s1356_s0 }
  0x69   : > { %560 = vmatpush.msra.mxu1 %v538_v47 }
  0x6a   : > { %s769_s3 = sshll.u32 %s1804_s25, 4  ;;  %p1358_p12 = pnand %p1357_p4, %p1626_p5  ;;  %s770_s3 = int_to_ptr.hbm [resolvable:$true] %s769_s3 }
  0x6b   : > { %561 = vmatpush.msra.mxu1 %v537_v49 }
  0x6c   : > { %945 = vmatmul.msk.f32.vlgmr.msra.gmra.mxu1 %vm513_vm2, %v542_v50  ;;  %p1359_p13 = pneg %p1358_p12 }
  0xe3   : > { %v534_v12 = vpop.f32.mrf.mxu0 }
  0xe9   : > { %v563_v52 = vpop.f32.mrf.mxu1 }
  0xeb   : > { %v591_v14 = vpop.f32.mrf.mxu2 }
  0xec   : > { %v592_v15 = vadd.f32 %v591_v14, %v534_v12 }
  0xee   : > { %v594_v16 = vadd.f32 %v592_v15, %v569_v13 }
  0xf0   : > { %1086 = vtanh.f32 %v594_v16  ;;  %v947_v19 = vmul.f32 -1.442695, %v594_v16 }
  0xf2   : > { %1088 = vpow2.f32 %v947_v19 }
  0xf6   : > { %v1087_v17 = vpop.eup %1086 }
  0xf7   : > { %622 = vrot.lane.b32.xlu0 %v1087_v17, %s1460_s1 }
  0xf8   : > { %v1089_v20 = vpop.eup %1088 }
  0xf9   : > { %v598_v21 = vadd.f32 1.0, %v1089_v20 }
  0xfb   : > { %1090 = vrcp.f32 %v598_v21  ;;  %v610_v27 = vand.u32 2147483648, %v598_v21  ;;  %vm604_vm4 = vweird.f32 %v598_v21  ;;  %v608_v28 = vand.u32 2147483647, %v598_v21 }
  0xfd   : > { %v611_v30 = vor.u32 1.1754944e-38, %v610_v27  ;;  %vm609_vm6 = vcmp.eq.f32.partialorder %v608_v28, 8.507059e+37 }
  0xff   : > { %617 = vrot.lane.b32.xlu0 %v615_v18, %s1461_s16 }
 0x101   : > { %v1091_v22 = vpop.eup %1090 }
 0x102   : > { %v600_v23 = vmul.f32 %v1091_v22, %v598_v21  ;;  %vm605_vm3 = vweird.f32 %v1091_v22 }
 0x103   : > { %vm606_vm5 = vmor %vm604_vm4, %vm605_vm3 }
 0x104   : > { %v601_v24 = vsub.f32 1.0, %v600_v23 }
 0x106   : > { %v602_v25 = vmul.f32 %v1091_v22, %v601_v24 }
 0x107   : > { %698 = vrot.lane.b32.xlu0 %v696_v48, %s1461_s16 }
 0x108   : > { %v603_v26 = vadd.f32 %v1091_v22, %v602_v25 }
 0x10a   : > { %v607_v29 = vsel %vm606_vm5, %v1091_v22, %v603_v26 }
 0x10b   : > { %v612_v32 = vsel %vm609_vm6, %v611_v30, %v607_v29 }
 0x169   : > { %v623_v31 = vpop.permute.xlu0 %622 }
 0x16a   : > { %v625_v33 = vmul.f32 %v623_v31, %v612_v32 }
 0x16c   : > { %627 = vrot.lane.b32.xlu1 %v625_v33, %s1461_s16 }
 0x171   : > { %v618_v34 = vpop.permute.xlu0 %617 }
 0x172   : > { %v620_v35 = vmul.f32 %v618_v34, %v612_v32 }
 0x179   : > { %v699_v9 = vpop.permute.xlu0 %698 }
 0x1de   : > { %v628_v36 = vpop.permute.xlu1 %627 }
 0x1df   : > { %v630_v37 = vadd.f32 %v628_v36, %v620_v35 }
 0x1e1   : > { %1092 = vtanh.f32 %v630_v37 }
 0x1e7   : > { %v1093_v38 = vpop.eup %1092 }
 0x1e8   : > { %633 = vrot.lane.b32.xlu1 %v1093_v38, %s1460_s1 }
 0x25a   : > { %v634_v44 = vpop.permute.xlu1 %633 }
 0x25b   : > { %v636_v45 = vmul.f32 %v634_v44, %v612_v32 }
 0x25d   : > { %638 = vrot.lane.b32.xlu2 %v636_v45, %s1461_s16 }
 0x2b7   : > { %v639_v51 = vpop.permute.xlu2 %638 }
 0x2b8   : > { %641 = vst.msk [vmem:[#allocation15] sm:$0xff] %vm513_vm2, %v639_v51  ;;  %948 = vmatmul.msk.f32.vlgmr.msra.gmra.mxu3 %vm513_vm2, %v639_v51 }
 0x33b   : > { %v671_v54 = vpop.f32.mrf.mxu3 }
 0x33c   : > { %v672_v55 = vadd.f32 %v671_v54, %v563_v52 }
 0x33e   : > { %v674_v56 = vadd.f32 %v672_v55, %v651_v53 }
 0x340   : > { %1094 = vtanh.f32 %v674_v56  ;;  %v949_v58 = vmul.f32 -1.442695, %v674_v56 }
 0x342   : > { %1096 = vpow2.f32 %v949_v58 }
 0x346   : > { %v1095_v57 = vpop.eup %1094 }
 0x347   : > { %703 = vrot.lane.b32.xlu2 %v1095_v57, %s1460_s1 }
 0x348   : > { %v1097_v59 = vpop.eup %1096 }
 0x349   : > { %v678_v60 = vadd.f32 1.0, %v1097_v59 }
 0x34b   : > { %1098 = vrcp.f32 %v678_v60  ;;  %v690_v2 = vand.u32 2147483648, %v678_v60  ;;  %vm684_vm8 = vweird.f32 %v678_v60  ;;  %v688_v3 = vand.u32 2147483647, %v678_v60 }
 0x34d   : > { %v691_v5 = vor.u32 1.1754944e-38, %v690_v2  ;;  %vm689_vm10 = vcmp.eq.f32.partialorder %v688_v3, 8.507059e+37 }
 0x351   : > { %v1099_v61 = vpop.eup %1098 }
 0x352   : > { %v680_v62 = vmul.f32 %v1099_v61, %v678_v60  ;;  %vm685_vm7 = vweird.f32 %v1099_v61 }
 0x353   : > { %vm686_vm9 = vmor %vm684_vm8, %vm685_vm7 }
 0x354   : > { %v681_v63 = vsub.f32 1.0, %v680_v62 }
 0x356   : > { %v682_v0 = vmul.f32 %v1099_v61, %v681_v63 }
 0x358   : > { %v683_v1 = vadd.f32 %v1099_v61, %v682_v0 }
 0x35a   : > { %v687_v4 = vsel %vm686_vm9, %v1099_v61, %v683_v1 }
 0x35b   : > { %v692_v6 = vsel %vm689_vm10, %v691_v5, %v687_v4 }
 0x35c   : > { %v701_v10 = vmul.f32 %v699_v9, %v692_v6 }
 0x3a1   : > { %v704_v7 = vpop.permute.xlu2 %703 }
 0x3a2   : > { %v706_v8 = vmul.f32 %v704_v7, %v692_v6 }
 0x3a4   : > { %708 = vrot.lane.b32.xlu1 %v706_v8, %s1461_s16 }
 0x3ac   : > { %643 = vrot.lane.b32.xlu1 %v630_v37, %s1462_s6 }
 0x416   : > { %v709_v11 = vpop.permute.xlu1 %708 }
 0x417   : > { %v711_v12 = vadd.f32 %v709_v11, %v701_v10 }
 0x419   : > { %1100 = vtanh.f32 %v711_v12 }
 0x41e   : > { %v644_v13 = vpop.permute.xlu1 %643 }
 0x41f   : > { %v1101_v14 = vpop.eup %1100  ;;  %646 = vst.msk [vmem:[#allocation17] sm:$0xff] %vm513_vm2, %v644_v13 }
 0x420   : > { %714 = vrot.lane.b32.xlu2 %v1101_v14, %s1460_s1  ;;  %s1464_s1 = smov [#allocation17]  }
 0x428   : > { %724 = vrot.lane.b32.xlu2 %v711_v12, %s1462_s6 }
 0x47a   : > { %v715_v15 = vpop.permute.xlu2 %714 }
 0x47b   : > { %v717_v16 = vmul.f32 %v715_v15, %v692_v6 }
 0x47d   : > { %719 = vrot.lane.b32.xlu0 %v717_v16, %s1461_s16  ;;  %s1723_s16 = sshll.u32 %s1464_s1, 4  ;;  %s1360_s1 = scalar_lea.hbm %s1777_s9, 48  ;;  %s768_s16 = int_to_ptr.vmem [resolvable:$true] %s1723_s16 }
 0x47e   : > { %p1362_p8 = scmp.lt.s32.totalorder %s1360_s1, %s1356_s0 }
 0x480   : > { %p1363_p9 = por %p1362_p8, %p1361_p7 }
 0x482   : > { %v725_v17 = vpop.permute.xlu2 %724  ;;  %p1364_p10 = pnand %p1363_p9, %p1359_p13 }
 0x483   : > { %727 = vst.msk [vmem:[#allocation17 + $0x8] sm:$0xff] %vm513_vm2, %v725_v17 }
 0x4ef   : > { %v720_v18 = vpop.permute.xlu0 %719 }
 0x4f0   : > { %722 = vst.msk [vmem:[#allocation15 + $0x8] sm:$0xff] %vm513_vm2, %v720_v18 }
 0x4f1   : > { %728 = vst.msk [vmem:[%s1677_s2] sm:$0xff] %vm513_vm2, %v720_v18 }
 0x4f2   : > { %986 = dma.vmem_to_hbm [thread:$0]  (%p1805_p1), %s754_s12, 256, %s756_s23, [#allocation16], %s1465_s7, %s1465_s7, %s1466_s14  }
 0x4f3   : > { %1367 = shalt.err (!%p1364_p10)
}
 0x4f4   : > { %984 = dma.vmem_to_hbm [thread:$0]  (%p1626_p5), %s743_s26, 128, %s745_s28, %s730_s29  }
 0x4f5   : > { %p1806_p0 = pmov %p1805_p1 }
 0x4f7   : > { %988 = dma.vmem_to_hbm [thread:$0]  (%p1806_p0), %s768_s16, 256, %s770_s3, [#allocation16], %s1465_s7, %s1465_s7, %s1466_s14  }
 0x4f8   : > { %p1807_p11 = pmov %p1806_p0 }
 0x4f9   : > { %p1808_p2 = pmov %p1806_p0 }
 0x4fa   : > { %1429 = dma.done.wait (%p1807_p11), [#allocation16], 512  }
 0x4fb   : > { %1431 = vsyncadd (%p1808_p2), [#allocation16], 4294966784 }
 0x4fc PF: > { %p1038_p3 = scmp.ge.s32.totalorder %s1450_s20, 2  ;;  %s794_s27 = sand.u32 1, %s1438_s17  }
 0x4fd   : > { %s795_s30 = scalar_lea.sflag [#allocation4], %s794_s27 }
 0x4fe   : > { %p1018_p1 = pnand %p1038_p3, %p1630_p6 }
 0x500   : > { %p1019_p4 = pneg %p1018_p1 }
 0x502   : > { %1433 = dma.done.wait (%p1019_p4), %s795_s30, 128  }
 0x503   : > { %1435 = vsyncadd (%p1019_p4), %s795_s30, 4294967168  ;;  %p29_p5 = scmp.ge.s32.totalorder %s1598_s13, 8   ;;  %s1809_s17 = smov %s1442_s18 }
 0x504   : > { %s1810_s18 = smov %s1446_s19  ;;  %s1811_s19 = smov %s1609_s22 }
 0x505   : > { %s1812_s20 = smov %s1598_s13  ;;  %31 = sbr.rel (!%p29_p5) target bundleno = 18 (0x12), region = 147 }
 0x50a   :  { %801 = vsyncpa [#allocation3], 1 }
 0x50b   :  { %803 = vsyncpa [#allocation3 + $0x1], 1 }
 0x50c   :  { %804 = vsyncpa [#allocation6], 1 }
 0x50d   :  { %805 = vsyncpa [#allocation9], 1 }
 0x50e   :  { %806 = vsyncpa [#allocation12], 1 }
 0x50f   :  { %807 = vsyncpa [#allocation4], 1 }
 0x510   :  { %809 = vsyncpa [#allocation4 + $0x1], 1 }
 0x511   :  { %810 = vsyncpa [#allocation16], 1 }

</bundles_post_ra>
